<compile_context>
chip_gen: v5e
topology: v5e:2x2
jax: 0.10.0
libtpu: 0.0.40
codegen_flags: <defaults>
</compile_context>

<pallas_src>
import numpy as np
import jax
import jax.numpy as jnp
from jax import lax
from jax.experimental import pallas as pl
from jax.experimental.pallas import tpu as pltpu


def _round_up(x, m):
    return ((x + m - 1) // m) * m


def _vmem_cap_bytes():
    """Physical VMEM per core minus headroom (128 MiB on v5e/v6e, 64 MiB on v7x)."""
    try:
        cap = int(pltpu.get_tpu_info().vmem_capacity_bytes)
    except Exception:
        cap = 64 << 20                      # conservative fallback (v7x)
    return int(max(min(cap - (8 << 20), 100 << 20), 16 << 20))


# ---------------------------------------------------------------------------
# Kernel 1: weighted cross entropy  (F.cross_entropy(logits.transpose(1,2), tgt, weight))
# Each grid step emits partial (numer, denom) for its row tile into a lane-dense block;
# all decoder layers share one launch.
# ---------------------------------------------------------------------------
def _weighted_ce_kernel(logits_ref, tgt_ref, w_ref, out_ref):
    logits = logits_ref[...].astype(jnp.float32)          # (R, C)
    tgt = tgt_ref[...]                                     # (R, 1) int32 (-1 => padding row)
    w = w_ref[...].astype(jnp.float32)                     # (1, C)

    m = jnp.max(logits, axis=1, keepdims=True)
    lse = jnp.log(jnp.sum(jnp.exp(logits - m), axis=1, keepdims=True)) + m
    cls = lax.broadcasted_iota(jnp.int32, logits.shape, 1)
    onehot = (cls == tgt).astype(jnp.float32)              # all-zero for padding rows
    logp_t = jnp.sum(onehot * (logits - lse), axis=1, keepdims=True)   # (R, 1)
    w_t = jnp.sum(onehot * w, axis=1, keepdims=True)                   # (R, 1)
    numer = jnp.sum(-(w_t * logp_t))
    denom = jnp.sum(w_t)

    lane = lax.broadcasted_iota(jnp.int32, out_ref.shape, 2)           # (1, 1, 128)
    out_ref[...] = jnp.where(lane == 0, numer, jnp.where(lane == 1, denom, 0.0))


def weighted_cross_entropy_layers(logits_all, targets_all, class_weight):
    """logits_all (L, N, C), targets_all (L, N) int, class_weight (C,) -> (L,) per-layer CE."""
    L, N, C = logits_all.shape
    # Large row tiles amortize the ~0.35 us per-grid-step overhead; cap the logits block at
    # ~4 MiB so the double-buffered pipeline stays well inside every generation's VMEM.
    row_cap = max(8, (((4 << 20) // max(4 * C, 1)) // 8) * 8)
    tile = min(_round_up(max(N, 1), 8), 1024, row_cap)
    n_pad = _round_up(N, tile)
    logits_all = logits_all.astype(jnp.float32)
    targets_all = targets_all.astype(jnp.int32)
    if n_pad != N:
        logits_all = jnp.pad(logits_all, ((0, 0), (0, n_pad - N), (0, 0)))
        targets_all = jnp.pad(targets_all, ((0, 0), (0, n_pad - N)), constant_values=-1)
    tiles_per_layer = n_pad // tile
    num_tiles = L * tiles_per_layer

    out = pl.pallas_call(
        _weighted_ce_kernel,
        out_shape=jax.ShapeDtypeStruct((num_tiles, 1, 128), jnp.float32),
        grid=(num_tiles,),
        in_specs=[
            pl.BlockSpec((tile, C), lambda i: (i, 0)),
            pl.BlockSpec((tile, 1), lambda i: (i, 0)),
            pl.BlockSpec((1, C), lambda i: (0, 0)),
        ],
        out_specs=pl.BlockSpec((1, 1, 128), lambda i: (i, 0, 0)),
        compiler_params=pltpu.CompilerParams(dimension_semantics=("parallel",)),
    )(
        logits_all.reshape(L * n_pad, C),
        targets_all.reshape(L * n_pad, 1),
        class_weight.reshape(1, C).astype(jnp.float32),
    )
    partial = out[:, 0, :2].reshape(L, tiles_per_layer, 2)
    sums = jnp.sum(partial, axis=1)                        # (L, 2): [numer, denom]
    return sums[:, 0] / sums[:, 1]


# ---------------------------------------------------------------------------
# Kernel 2: per-instance mask-loss statistics (projection dice + pairwise term)
# ---------------------------------------------------------------------------
_NEIGHBOR_OFFSETS = ((-2, -2), (-2, 0), (-2, 2),
                     (0, -2),           (0, 2),
                     (2, -2),  (2, 0),  (2, 2))


def _mask_loss_kernel(sim_idx_ref, src_ref, tgt_ref, simb_ref, out_ref):
    del sim_idx_ref                                # consumed by the sim index_map only
    src = src_ref[...].astype(jnp.float32)         # (1, H, W) mask logits (bf16 transport)
    tgt = tgt_ref[...].astype(jnp.float32)         # (1, H, W) GT masks    (bf16 transport)
    simb = simb_ref[...].astype(jnp.int32)         # (1, H, W) bit k == (sim_k >= 0.3)
    _, H, W = src.shape

    def _rsum(x):                                  # (1, a, b) -> (1, 1, 1)
        return jnp.sum(jnp.sum(x, axis=2, keepdims=True), axis=1, keepdims=True)

    # ---- projection term: dice on max-projections over H and over W ----
    # sigmoid is monotonic -> sigmoid(max(x)) == max(sigmoid(x)); avoids a full H*W
    # transcendental pass on the single EUP slot.
    sy = jax.nn.sigmoid(jnp.max(src, axis=1, keepdims=True))   # (1, 1, W)
    ty = jnp.max(tgt, axis=1, keepdims=True)
    sx = jax.nn.sigmoid(jnp.max(src, axis=2, keepdims=True))   # (1, H, 1)
    tx = jnp.max(tgt, axis=2, keepdims=True)
    inter_y = _rsum(sy * ty)
    union_y = _rsum(sy * sy) + _rsum(ty * ty)
    inter_x = _rsum(sx * tx)
    union_x = _rsum(sx * sx) + _rsum(tx * tx)

    # ---- pairwise term: -log P(same label) over 8 dilated neighbors ----
    log_fg = jax.nn.log_sigmoid(src)               # single transcendental pass;
    # log sigmoid(-x) = log sigmoid(x) - x, so the background branch is derived, not recomputed.

    # Hoisted border-validity masks (JAX does not CSE broadcast_in_dim; build once, reuse).
    iy = lax.broadcasted_iota(jnp.int32, (1, H, 1), 1)
    ix = lax.broadcasted_iota(jnp.int32, (1, 1, W), 2)
    valid_y = {d: ((iy + d >= 0) & (iy + d < H)).astype(jnp.float32) for d in (-2, 2)}
    valid_x = {d: ((ix + d >= 0) & (ix + d < W)).astype(jnp.float32) for d in (-2, 2)}

    def _shift(x, dy, dx):
        # shifted[0, y, x] = x[0, y+dy, x+dx], zero outside (matches F.unfold zero padding).
        # XLU rotate + precomputed 0/1 multiplies instead of concat copies / per-offset iotas.
        if dy != 0:
            x = pltpu.roll(x, (-dy) % H, axis=1) * valid_y[dy]
        if dx != 0:
            x = pltpu.roll(x, (-dx) % W, axis=2) * valid_x[dx]
        return x

    pw_plane = jnp.zeros(src.shape, jnp.float32)
    w_plane = jnp.zeros(src.shape, jnp.float32)
    for k, (dy, dx) in enumerate(_NEIGHBOR_OFFSETS):
        sh_fg = _shift(log_fg, dy, dx)
        sh_src = _shift(src, dy, dx)
        same_fg = log_fg + sh_fg                   # log p_fg(p) p_fg(p+d)
        d = src + sh_src                           # = same_fg - same_bg
        # logsumexp(same_fg, same_bg) with a single exp + log1p (vs 2 exp + 1 log)
        log_same = same_fg + jnp.maximum(-d, 0.0) + jnp.log1p(jnp.exp(-jnp.abs(d)))
        w = jnp.where((simb & (1 << k)) != 0, tgt, 0.0)
        pw_plane = pw_plane - log_same * w
        w_plane = w_plane + w
    # Reductions hoisted out of the neighbor loop: 2 full-plane reduces instead of 16.
    pw_num = _rsum(pw_plane)
    w_sum = _rsum(w_plane)

    lane = lax.broadcasted_iota(jnp.int32, out_ref.shape, 2)    # (1, 1, 128)
    zero = jnp.zeros(out_ref.shape, jnp.float32)
    out_ref[...] = (jnp.where(lane == 0, inter_y, zero)
                    + jnp.where(lane == 1, union_y, zero)
                    + jnp.where(lane == 2, inter_x, zero)
                    + jnp.where(lane == 3, union_x, zero)
                    + jnp.where(lane == 4, pw_num, zero)
                    + jnp.where(lane == 5, w_sum, zero))


def mask_loss_stats(src_masks, tgt_masks, sim_bits, sim_row_idx):
    """src/tgt (N, H, W) float, sim_bits (B, H, W) uint8, sim_row_idx (N,) int ->
       (N, 6) per-instance stats [inter_y, union_y, inter_x, union_x, pairwise_num, w_sum]."""
    n, H, W = src_masks.shape

    # Per-step working set: double-buffered transport (bf16 src + bf16 tgt + u8 sim) plus
    # ~12 live f32 temporaries in the body, plus output blocks and slack; capped by the
    # actual per-core VMEM of the device (so v7x's 64 MiB is never exceeded).
    vmem_need = 2 * H * W * (2 + 2 + 1) + 12 * H * W * 4 + 4 * 128 * 4 + (2 << 20)
    vmem_limit = int(min(_vmem_cap_bytes(), max(vmem_need, 32 << 20)))

    out = pl.pallas_call(
        _mask_loss_kernel,
        out_shape=jax.ShapeDtypeStruct((n, 1, 128), jnp.float32),
        grid_spec=pltpu.PrefetchScalarGridSpec(
            num_scalar_prefetch=1,
            grid=(n,),
            in_specs=[
                pl.BlockSpec((1, H, W), lambda i, sidx: (i, 0, 0)),
                pl.BlockSpec((1, H, W), lambda i, sidx: (i, 0, 0)),
                # per-image sim plane row-gathered in-kernel via the prefetched batch index
                pl.BlockSpec((1, H, W), lambda i, sidx: (sidx[i], 0, 0)),
            ],
            out_specs=pl.BlockSpec((1, 1, 128), lambda i, sidx: (i, 0, 0)),
        ),
        compiler_params=pltpu.CompilerParams(
            # one instance per step => grid length N >= 2 in practice, so the parallel axis
            # actually feeds both v7x TensorCores while keeping the working set tiny.
            dimension_semantics=("parallel",),
            vmem_limit_bytes=vmem_limit,
        ),
    )(
        jnp.asarray(sim_row_idx, dtype=jnp.int32),
        src_masks.astype(jnp.bfloat16),            # bf16 transport; compute stays f32 in-kernel
        tgt_masks.astype(jnp.bfloat16),
        sim_bits,                                  # uint8 bit-packed similarity
    )
    return out[:, 0, :6]


def pack_similarity_bits(images_lab_sim, threshold=0.3):
    """List of (1, 8, H, W) color-similarity maps -> (B, H, W) uint8 with bit k set iff
       neighbor-k similarity >= threshold (32x less HBM traffic than shipping f32 sim)."""
    sims = jnp.concatenate(
        [jnp.asarray(s).reshape(1, 8, s.shape[-2], s.shape[-1]) for s in images_lab_sim],
        axis=0)                                                       # (B, 8, H, W)
    shifts = jnp.asarray(1 << np.arange(8), dtype=jnp.int32).reshape(1, 8, 1, 1)
    return jnp.sum(jnp.where(sims >= threshold, shifts, 0), axis=1).astype(jnp.uint8)


# ---------------------------------------------------------------------------
# SetCriterion wrapper (glue: matching bookkeeping, gathers, scalar combines)
# ---------------------------------------------------------------------------
class SetCriterionPallas:
    def __init__(self, num_classes, matcher, weight_dict, eos_coef, losses,
                 num_points, oversample_ratio, importance_sample_ratio):
        assert set(losses) <= {'labels', 'masks'}, f'unsupported losses: {losses}'
        self.num_classes = num_classes
        self.matcher = matcher
        self.weight_dict = weight_dict
        self.eos_coef = eos_coef
        self.losses = losses
        self.num_points = num_points
        self.oversample_ratio = oversample_ratio
        self.importance_sample_ratio = importance_sample_ratio
        ew = np.ones(num_classes + 1, np.float32)
        ew[-1] = eos_coef
        self.empty_weight = jnp.asarray(ew)
        self.laplacian_kernel = jnp.asarray(
            [-1, -1, -1, -1, 8, -1, -1, -1, -1], dtype=jnp.float32).reshape(1, 1, 3, 3)
        # TODO(synk): host-side iteration counter; under jax.jit the warmup factor would be
        # baked at trace time (same caveat as the reference buffer under scripting).
        self._iter = 0
        self._warmup_iters = 1000

    # --- index bookkeeping (host-side, mirrors the torch helpers) ---
    def _get_src_permutation_idx(self, indices):
        batch_idx = np.concatenate(
            [np.full(len(np.asarray(src)), i, dtype=np.int64)
             for i, (src, _) in enumerate(indices)])
        src_idx = np.concatenate([np.asarray(src, dtype=np.int64) for src, _ in indices])
        return batch_idx, src_idx

    # --- classification loss: all decoder layers fused into one kernel launch ---
    def _loss_labels_all(self, layer_outputs, targets, layer_indices):
        L = len(layer_outputs)
        B, Q, C = layer_outputs[0]['pred_logits'].shape
        logits_all = jnp.stack(
            [lo['pred_logits'].astype(jnp.float32) for lo in layer_outputs], axis=0)
        tcs = []
        for indices in layer_indices:
            batch_idx, src_idx = self._get_src_permutation_idx(indices)
            target_classes = jnp.full((B, Q), self.num_classes, dtype=jnp.int32)
            if len(batch_idx) > 0:
                target_classes_o = jnp.concatenate(
                    [jnp.asarray(t['labels'])[np.asarray(J, dtype=np.int64)]
                     for t, (_, J) in zip(targets, indices) if len(np.asarray(J)) > 0])
                target_classes = target_classes.at[
                    (jnp.asarray(batch_idx), jnp.asarray(src_idx))
                ].set(target_classes_o.astype(jnp.int32))
            tcs.append(target_classes)
        targets_all = jnp.stack(tcs, axis=0)
        ce = weighted_cross_entropy_layers(
            logits_all.reshape(L, B * Q, C), targets_all.reshape(L, B * Q), self.empty_weight)
        return [ce[i] for i in range(L)]

    # --- mask losses (projection dice + pairwise), all layers fused into one stats launch ---
    def _loss_masks_all(self, layer_outputs, targets, layer_indices, images_lab_sim):
        L = len(layer_outputs)
        pred0 = layer_outputs[0]['pred_masks']

        # (sim >= 0.3) bit-packed ONCE per image, shared by every decoder layer, and
        # row-gathered per instance INSIDE the kernel (no N-way HBM duplication).
        sim_bits = pack_similarity_bits(images_lab_sim)               # (B, H, W) uint8

        src_list, tgt_list, bidx_list, counts, warmups = [], [], [], [], []
        for lo, indices in zip(layer_outputs, layer_indices):
            # Matches the reference: _iter advances once per decoder layer (main + each aux).
            self._iter += 1
            warmups.append(min(self._iter / float(self._warmup_iters), 1.0))
            batch_idx, src_idx = self._get_src_permutation_idx(indices)
            n = len(batch_idx)
            counts.append(n)
            if n == 0:
                continue
            src_m = lo['pred_masks'][jnp.asarray(batch_idx), jnp.asarray(src_idx)]   # (n,H,W)
            tgt_m = jnp.concatenate(
                [jnp.asarray(t['masks'])[np.asarray(J, dtype=np.int64)]
                 for t, (_, J) in zip(targets, indices) if len(np.asarray(J)) > 0], axis=0)
            # TODO(synk): reference bilinearly resizes target masks to the prediction size;
            # targets here are built at the prediction resolution so that resize is identity.
            src_list.append(src_m)
            tgt_list.append(tgt_m.astype(jnp.float32))
            bidx_list.append(np.asarray(batch_idx, dtype=np.int32))
            # TODO(synk): the src/tgt gathers above could also move in-kernel (per-layer
            # launches with a flat B*Q row index prefetched into SMEM); the sim gather
            # already happens inside the kernel via PrefetchScalarGridSpec.

        if not src_list:
            zero = jnp.sum(pred0) * 0.0
            return [(zero, zero) for _ in range(L)]

        stats = mask_loss_stats(jnp.concatenate(src_list, axis=0),
                                jnp.concatenate(tgt_list, axis=0),
                                sim_bits,
                                np.concatenate(bidx_list))            # (N_all, 6)

        eps = 1e-5
        results, off = [], 0
        for li in range(L):
            n = counts[li]
            if n == 0:
                zero = jnp.sum(layer_outputs[li]['pred_masks']) * 0.0
                results.append((zero, zero))
                continue
            s = stats[off:off + n]
            off += n
            inter_y, union_y = s[:, 0], s[:, 1]
            inter_x, union_x = s[:, 2], s[:, 3]
            pw_num, w_sum = s[:, 4], s[:, 5]
            loss_y = 1.0 - 2.0 * inter_y / (union_y + eps)
            loss_x = 1.0 - 2.0 * inter_x / (union_x + eps)
            loss_prj = jnp.mean(loss_x + loss_y)
            loss_pair = (jnp.sum(pw_num) / jnp.maximum(jnp.sum(w_sum), 1.0)
                         * 0.25 * warmups[li])
            results.append((loss_prj, loss_pair))
        # TODO(synk): the reference also builds `inc_mask` (bilinear down/up sample +
        # laplacian conv + threshold) but never uses it; that dead branch is omitted.
        return results

    def __call__(self, outputs, targets, images_lab_sim):
        outputs_without_aux = {k: v for k, v in outputs.items() if k != 'aux_outputs'}
        layer_outputs = [outputs_without_aux] + list(outputs.get('aux_outputs', []))
        layer_indices = [self.matcher(lo, targets) for lo in layer_outputs]
        # kept for parity with the reference (unused by the projection/pairwise losses)
        _ = max(float(sum(len(t['labels']) for t in targets)), 1.0)

        losses = {}

        def _name(base, li):
            return base if li == 0 else f'{base}_{li - 1}'

        if 'labels' in self.losses:
            ce = self._loss_labels_all(layer_outputs, targets, layer_indices)
            for li in range(len(layer_outputs)):
                losses[_name('loss_ce', li)] = ce[li]

        if 'masks' in self.losses:
            mk = self._loss_masks_all(layer_outputs, targets, layer_indices, images_lab_sim)
            for li in range(len(layer_outputs)):
                losses[_name('loss_mask', li)] = mk[li][0]
                losses[_name('loss_bound', li)] = mk[li][1]

        return losses


def identity_matcher(outputs, targets):
    # TODO(synk): the real matcher is an external Hungarian-matching module injected into
    # __init__; a deterministic identity matching is supplied here instead.
    return [(np.arange(len(t['labels']), dtype=np.int64),
             np.arange(len(t['labels']), dtype=np.int64)) for t in targets]


if __name__ == "__main__":
    key = jax.random.PRNGKey(0)
    B, Q, num_classes, H, W = 2, 8, 6, 16, 16
    num_aux = 2
    keys = jax.random.split(key, 8)

    def make_layer(k):
        k1, k2 = jax.random.split(k)
        return {'pred_logits': jax.random.normal(k1, (B, Q, num_classes + 1), dtype=jnp.float32),
                'pred_masks': jax.random.normal(k2, (B, Q, H, W), dtype=jnp.float32)}

    outputs = make_layer(keys[0])
    outputs['aux_outputs'] = [make_layer(keys[1 + i]) for i in range(num_aux)]

    n_targets = [3, 2]
    lkeys = jax.random.split(keys[5], B)
    mkeys = jax.random.split(keys[6], B)
    targets = []
    for i, n in enumerate(n_targets):
        labels = jax.random.randint(lkeys[i], (n,), 0, num_classes, dtype=jnp.int32)
        masks = (jax.random.uniform(mkeys[i], (n, H, W)) > 0.5).astype(jnp.float32)
        targets.append({'labels': labels, 'masks': masks})

    skeys = jax.random.split(keys[7], B)
    images_lab_sim = [jax.random.uniform(skeys[i], (1, 8, H, W), dtype=jnp.float32)
                      for i in range(B)]

    criterion = SetCriterionPallas(
        num_classes=num_classes,
        matcher=identity_matcher,
        weight_dict={'loss_ce': 2.0, 'loss_mask': 5.0, 'loss_bound': 1.0},
        eos_coef=0.1,
        losses=['labels', 'masks'],
        num_points=112,
        oversample_ratio=3.0,
        importance_sample_ratio=0.75,
    )

    losses = criterion(outputs, targets, images_lab_sim)
    losses = {k: jax.block_until_ready(v) for k, v in losses.items()}

    expected = {'loss_ce', 'loss_mask', 'loss_bound'}
    for i in range(num_aux):
        expected |= {f'loss_ce_{i}', f'loss_mask_{i}', f'loss_bound_{i}'}
    assert set(losses.keys()) == expected
    assert all(bool(jnp.isfinite(v)) for v in losses.values())
    print("KERNEL_OK")
</pallas_src>

<mosaic_0001>
module attributes {stable_mosaic.version = 11 : i64} {
  func.func @_weighted_ce_kernel(%arg0: i32, %arg1: memref<16x7xf32, #tpu.memory_space<vmem>>, %arg2: memref<16x1xi32, #tpu.memory_space<vmem>>, %arg3: memref<1x7xf32, #tpu.memory_space<vmem>>, %arg4: memref<1x1x128xf32, #tpu.memory_space<vmem>>) attributes {dimension_semantics = [#tpu.dimension_semantics<parallel>], iteration_bounds = array<i64: 3>, scalar_prefetch = 0 : i64, scratch_operands = 0 : i64, tpu.core_type = #tpu.core_type<tc>, window_params = [{transform_indices = @transform_0, window_bounds = array<i64: 16, 7>}, {transform_indices = @transform_1, window_bounds = array<i64: 16, 1>}, {pipeline_mode = #tpu.pipeline_mode<synchronous>, transform_indices = @transform_2, window_bounds = array<i64: 1, 7>}, {transform_indices = @transform_3, window_bounds = array<i64: 1, 1, 128>}]} {
    %c0 = arith.constant 0 : index
    %c0_0 = arith.constant 0 : index
    %0 = vector.load %arg1[%c0, %c0_0] : memref<16x7xf32, #tpu.memory_space<vmem>>, vector<16x7xf32>
    %c0_1 = arith.constant 0 : index
    %c0_2 = arith.constant 0 : index
    %1 = vector.load %arg2[%c0_1, %c0_2] : memref<16x1xi32, #tpu.memory_space<vmem>>, vector<16x1xi32>
    %c0_3 = arith.constant 0 : index
    %c0_4 = arith.constant 0 : index
    %2 = vector.load %arg3[%c0_3, %c0_4] : memref<1x7xf32, #tpu.memory_space<vmem>>, vector<1x7xf32>
    %cst = arith.constant dense<0xFF800000> : vector<16xf32>
    %3 = vector.multi_reduction <maximumf>, %0, %cst [1] : vector<16x7xf32> to vector<16xf32>
    %4 = vector.shape_cast %3 : vector<16xf32> to vector<16x1xf32>
    %5 = vector.broadcast %4 : vector<16x1xf32> to vector<16x7xf32>
    %6 = arith.subf %0, %5 : vector<16x7xf32>
    %7 = math.exp %6 : vector<16x7xf32>
    %cst_5 = arith.constant dense<0.000000e+00> : vector<16xf32>
    %8 = vector.multi_reduction <add>, %7, %cst_5 [1] : vector<16x7xf32> to vector<16xf32>
    %9 = vector.shape_cast %8 : vector<16xf32> to vector<16x1xf32>
    %10 = math.log %9 : vector<16x1xf32>
    %11 = arith.addf %10, %4 : vector<16x1xf32>
    %12 = tpu.iota {dimensions = array<i32: 1>} : vector<16x7xi32>
    %13 = vector.broadcast %1 : vector<16x1xi32> to vector<16x7xi32>
    %14 = arith.cmpi eq, %12, %13 : vector<16x7xi32>
    %15 = arith.extui %14 : vector<16x7xi1> to vector<16x7xi32>
    %16 = arith.sitofp %15 : vector<16x7xi32> to vector<16x7xf32>
    %17 = vector.broadcast %11 : vector<16x1xf32> to vector<16x7xf32>
    %18 = arith.subf %0, %17 : vector<16x7xf32>
    %19 = arith.mulf %16, %18 : vector<16x7xf32>
    %cst_6 = arith.constant dense<0.000000e+00> : vector<16xf32>
    %20 = vector.multi_reduction <add>, %19, %cst_6 [1] : vector<16x7xf32> to vector<16xf32>
    %21 = vector.shape_cast %20 : vector<16xf32> to vector<16x1xf32>
    %22 = vector.broadcast %2 : vector<1x7xf32> to vector<16x7xf32>
    %23 = arith.mulf %16, %22 : vector<16x7xf32>
    %cst_7 = arith.constant dense<0.000000e+00> : vector<16xf32>
    %24 = vector.multi_reduction <add>, %23, %cst_7 [1] : vector<16x7xf32> to vector<16xf32>
    %25 = vector.shape_cast %24 : vector<16xf32> to vector<16x1xf32>
    %26 = arith.mulf %25, %21 : vector<16x1xf32>
    %cst_8 = arith.constant 0.000000e+00 : f32
    %27 = vector.broadcast %cst_8 : f32 to vector<16x1xf32>
    %28 = arith.subf %27, %26 : vector<16x1xf32>
    %29 = vector.shape_cast %28 : vector<16x1xf32> to vector<1x16x1xf32>
    %cst_9 = arith.constant dense<0.000000e+00> : vector<1xf32>
    %30 = vector.multi_reduction <add>, %29, %cst_9 [1, 2] : vector<1x16x1xf32> to vector<1xf32>
    %31 = vector.shape_cast %30 : vector<1xf32> to vector<1x1x1xf32>
    %32 = vector.extract %31[0, 0, 0] : f32 from vector<1x1x1xf32>
    %33 = vector.shape_cast %25 : vector<16x1xf32> to vector<1x16x1xf32>
    %cst_10 = arith.constant dense<0.000000e+00> : vector<1xf32>
    %34 = vector.multi_reduction <add>, %33, %cst_10 [1, 2] : vector<1x16x1xf32> to vector<1xf32>
    %35 = vector.shape_cast %34 : vector<1xf32> to vector<1x1x1xf32>
    %36 = vector.extract %35[0, 0, 0] : f32 from vector<1x1x1xf32>
    %37 = tpu.iota {dimensions = array<i32: 2>} : vector<1x1x128xi32>
    %c0_i32 = arith.constant 0 : i32
    %38 = vector.broadcast %c0_i32 : i32 to vector<1x1x128xi32>
    %39 = arith.cmpi eq, %37, %38 : vector<1x1x128xi32>
    %c1_i32 = arith.constant 1 : i32
    %40 = vector.broadcast %c1_i32 : i32 to vector<1x1x128xi32>
    %41 = arith.cmpi eq, %37, %40 : vector<1x1x128xi32>
    %cst_11 = arith.constant 0.000000e+00 : f32
    %42 = vector.broadcast %36 : f32 to vector<1x1x128xf32>
    %43 = vector.broadcast %cst_11 : f32 to vector<1x1x128xf32>
    %44 = arith.select %41, %42, %43 : vector<1x1x128xi1>, vector<1x1x128xf32>
    %45 = vector.broadcast %32 : f32 to vector<1x1x128xf32>
    %46 = arith.select %39, %45, %44 : vector<1x1x128xi1>, vector<1x1x128xf32>
    %c0_12 = arith.constant 0 : index
    %c0_13 = arith.constant 0 : index
    %c0_14 = arith.constant 0 : index
    %47 = vector.load %arg4[%c0_12, %c0_13, %c0_14] : memref<1x1x128xf32, #tpu.memory_space<vmem>>, vector<1x1x128xf32>
    tpu.vector_store %arg4[%c0_12, %c0_13, %c0_14], %46 {strides = array<i32>} : memref<1x1x128xf32, #tpu.memory_space<vmem>>, vector<1x1x128xf32>,
    return
  }
  func.func @transform_0(%arg0: i32) -> (i32, i32) {
    %c0_i32 = arith.constant 0 : i32
    %c0_i32_0 = arith.constant 0 : i32
    return %arg0, %c0_i32 : i32, i32
  }
  func.func @transform_1(%arg0: i32) -> (i32, i32) {
    %c0_i32 = arith.constant 0 : i32
    %c0_i32_0 = arith.constant 0 : i32
    return %arg0, %c0_i32 : i32, i32
  }
  func.func @transform_2(%arg0: i32) -> (i32, i32) {
    %c0_i32 = arith.constant 0 : i32
    %c0_i32_0 = arith.constant 0 : i32
    %c0_i32_1 = arith.constant 0 : i32
    return %c0_i32, %c0_i32_0 : i32, i32
  }
  func.func @transform_3(%arg0: i32) -> (i32, i32, i32) {
    %c0_i32 = arith.constant 0 : i32
    %c0_i32_0 = arith.constant 0 : i32
    %c0_i32_1 = arith.constant 0 : i32
    return %arg0, %c0_i32, %c0_i32_0 : i32, i32, i32
  }
}

</mosaic_0001>

<bundles_post_ra>
// kernel: tpu_custom_call.1
= control target key start
LH: loop header
LB: loop body
LE: loop exit
PB: predicated region body
PF: predicated region fallthrough
CT: control target
= control target key end

     0   :  { %8 = vsyncpa [#allocation3], 0  ;;  %s631_s0 = inlined_call_operand.vmem [shape: f32[48,7], index: 0, kind: input, shape index: {}]   ;;  %s632_s1 = inlined_call_operand.vmem [shape: s32[48,1], index: 1, kind: input, shape index: {}]   ;;  %s633_s2 = inlined_call_operand.vmem [shape: f32[1,7], index: 2, kind: input, shape index: {}]   ;;  %s634_s3 = inlined_call_operand.hbm [shape: f32[3,1,128], index: 3, kind: output, shape index: {}]  }
   0x1   :  { %10 = vsyncpa [#allocation3 + $0x1], 0  ;;  %s527_s12 = smov 0   ;;  %s529_s13 = smov 0  }
   0x2   :  { %s531_s14 = smov 0   ;;  %s533_s15 = smov 0  }
   0x3 LB: > { %s548_s16 = sadd.s32 4294967295, %s503_s15   ;;  %s373_s17 = sadd.s32 4294967294, %s503_s15   ;;  %s503_s15 = sphi %s533_s15, %s640_s15   ;;  %s499_s14 = sphi %s531_s14, %s639_s14   ;;  %s495_s13 = sphi %s529_s13, %s638_s13   ;;  %s491_s12 = sphi %s527_s12, %s637_s12  }
   0x4   : > { %s552_s18 = sadd.s32 1, %s503_s15   ;;  %s96_s19 = sadd.s32 1, %s499_s14 }
   0x5   : > { %s93_s20 = ssub.s32 %s503_s15, %s552_s18  ;;  %p106_p0 = scmp.ne.s32.totalorder %s499_s14, %s495_s13 }
   0x6   : > { %p94_p1 = scmp.eq.s32.totalorder %s93_s20, 0  ;;  %p107_p2 = scmp.eq.s32.totalorder %s548_s16, 2 }
   0x7   : > { %p112_p3 = scmp.ne.s32.totalorder %s495_s13, %s491_s12  ;;  %p113_p4 = scmp.eq.s32.totalorder %s373_s17, 2 }
   0x8   : > { %s563_s21 = scalar_select %p94_p1, %s499_s14, %s96_s19  }
   0x9   : > { %p565_p5 = por %p107_p2, %p106_p0  ;;  %p569_p6 = por %p113_p4, %p112_p3 }
   0xa   : > { %p376_p7 = scmp.ge.s32.totalorder %s503_s15, 1  ;;  %p152_p8 = scmp.lt.s32.totalorder %s503_s15, 4 }
   0xc   : > { %p153_p9 = pnand %p376_p7, %p152_p8 }
   0xd   : > { %s377_s24 = sshll.u32 (!%p153_p9), %s548_s16, 1  ;;  %s178_s7 = sand.u32 (!%p153_p9), 1, %s495_s13  }
   0xe   : > { %156 = sbr.rel (%p153_p9) target bundleno = 600 (0x258), region = 32  ;;  %p181_p10 = scmp.lt.s32.totalorder (!%p153_p9), %s377_s24, 5 }
   0xf   : > { %s302_s10 = scalar_lea.hbm (!%p153_p9), %s634_s3, %s548_s16  ;;  %s179_s11 = scalar_lea.vmem (!%p153_p9), [#allocation2], %s178_s7 }
  0x10   : > { %s304_s17 = sshll.u32 (!%p153_p9), %s179_s11, 4  ;;  %s306_s20 = sshll.u32 (!%p153_p9), %s302_s10, 4  ;;  %s305_s17 = int_to_ptr.vmem [resolvable:$true] %s304_s17  ;;  %s307_s20 = int_to_ptr.hbm [resolvable:$true] %s306_s20 }
  0x11   : > { %s455_s26 = sshra.s32 (!%p153_p9), %s307_s20, 4  ;;  %s461_s29 = scalar_lea.hbm (!%p153_p9), %s634_s3, 3  ;;  %s456_s26 = int_to_ptr.hbm [resolvable:$true] %s455_s26 }
  0x12   : > { %s457_s16 = scalar_lea.hbm (!%p153_p9), %s456_s26, 1  ;;  %p462_p0 = scmp.lt.s32.totalorder (!%p153_p9), %s456_s26, %s634_s3 }
  0x13   : > { %s642_s24 = smov (!%p181_p10, %s377_s24), 5  ;;  %vm197_vm0 = vcmask 56320   ;;  %v505_v5 = vmov 0   ;;  %v222_v17 = vlaneseq  ;;  %v432_v20 = vld [vmem:[%s633_s2] ss:$0 sm:$0xff]  ;;  %v506_v21 = vmov 0.0   ;;  %p458_p11 = scmp.ne.s32.totalorder %s456_s26, %s457_s16 }
  0x14   : > { %s378_s25 = sshll.u32 %s642_s24, 3  ;;  %430 = vset.pattern.permute.xlu2 %v505_v5  ;;  %431 = vset.pattern.permute.xlu0 %v505_v5  ;;  %vm261_vm3 = vcmask 7168   ;;  %p463_p1 = scmp.lt.s32.totalorder %s461_s29, %s457_s16 }
  0x15   : > { %s184_s28 = scalar_lea.vmem %s631_s0, %s378_s25  ;;  %s190_s4 = scalar_lea.vmem %s632_s1, %s378_s25  ;;  %v586_v18 = vand.u32 127, %v222_v17 }
  0x16   : > { %v192_v0 = vld [vmem:[%s184_s28] sm:$0xff]  ;;  %v193_v2 = vld [vmem:[%s184_s28 + $0x8] sm:$0xff]  ;;  %s294_s25 = scalar_lea.sflag [#allocation3], %s178_s7  ;;  %p459_p12 = pnand %p458_p11, %p565_p5 }
  0x17   : > { %v198_v1 = vsel %vm197_vm0, %v192_v0, -inf  ;;  %v201_v3 = vsel %vm197_vm0, %v193_v2, -inf  ;;  %v194_v4 = vld [vmem:[%s190_s4] sm:$0xff]  ;;  %v195_v6 = vld [vmem:[%s190_s4 + $0x8] sm:$0xff]  ;;  %vm287_vm4 = vcmp.eq.s32.totalorder %v586_v18, 1  ;;  %vm286_vm5 = vcmp.eq.s32.totalorder %v586_v18, 0  ;;  %p464_p2 = por %p463_p1, %p462_p0 }
  0x18   : > { %199 = vmax.xlane.f32.xlu0 %v198_v1  ;;  %225 = vperm.xlu2 %430, %v194_v4   ;;  %p460_p13 = pneg %p459_p12 }
  0x1a   : > { %p465_p3 = pnand %p464_p2, %p460_p13 }
  0x20   : > { %202 = vmax.xlane.f32.xlu0 %v201_v3  ;;  %228 = vperm.xlu2 %430, %v195_v6  }
  0x72   : > { %v226_v19 = vpop.permute.xlu2 %225 }
  0x73   : > { %vm230_vm1 = vcmp.eq.s32.totalorder %v586_v18, %v226_v19 }
  0x74   : > { %v381_v22 = vsel %vm230_vm1, 1.0, %v506_v21 }
  0x75   : > { %v249_v23 = vmul.f32 %v432_v20, %v381_v22 }
  0x77   : > { %v251_v24 = vsel %vm197_vm0, %v249_v23, 0.0 }
  0x78   : > { %252 = vadd.xlane.f32.xlu2 %v251_v24 }
  0x7a   : > { %v229_v30 = vpop.permute.xlu2 %228 }
  0x7b   : > { %vm231_vm2 = vcmp.eq.s32.totalorder %v586_v18, %v229_v30 }
  0x7c   : > { %v382_v36 = vsel %vm231_vm2, 1.0, %v506_v21 }
  0x7d   : > { %v250_v38 = vmul.f32 %v432_v20, %v382_v36 }
  0x7f   : > { %v254_v41 = vsel %vm197_vm0, %v250_v38, 0.0 }
  0x8b   : > { %v200_v7 = vpop.xlane.xlu0 %199 }
  0x8c   : > { %v204_v8 = vsub.f32 %v192_v0, %v200_v7 }
  0x8e   : > { %v206_v9 = vmul.f32 1.442695, %v204_v8 }
  0x90   : > { %433 = vpow2.f32 %v206_v9 }
  0x93   : > { %v203_v10 = vpop.xlane.xlu0 %202 }
  0x94   : > { %v205_v11 = vsub.f32 %v193_v2, %v203_v10 }
  0x96   : > { %v434_v12 = vpop.eup %433  ;;  %v208_v13 = vmul.f32 1.442695, %v205_v11 }
  0x97   : > { %v210_v14 = vsel %vm197_vm0, %v434_v12, 0.0 }
  0x98   : > { %435 = vpow2.f32 %v208_v13  ;;  %211 = vadd.xlane.f32.xlu1 %v210_v14 }
  0x9e   : > { %v436_v15 = vpop.eup %435 }
  0x9f   : > { %v213_v16 = vsel %vm197_vm0, %v436_v15, 0.0 }
  0xa0   : > { %214 = vadd.xlane.f32.xlu1 %v213_v16 }
  0xeb   : > { %v253_v44 = vpop.xlane.xlu2 %252 }
  0xec   : > { %v274_v48 = vsel %vm261_vm3, %v253_v44, 0.0 }
 0x10b   : > { %v212_v25 = vpop.xlane.xlu1 %211 }
 0x10c   : > { %437 = vlog2.f32 %v212_v25 }
 0x112   : > { %v438_v26 = vpop.eup %437 }
 0x113   : > { %v217_v27 = vmul.f32 0.6931472, %v438_v26  ;;  %v215_v28 = vpop.xlane.xlu1 %214 }
 0x114   : > { %439 = vlog2.f32 %v215_v28 }
 0x115   : > { %v220_v29 = vadd.f32 %v217_v27, %v200_v7 }
 0x117   : > { %v236_v31 = vsub.f32 %v192_v0, %v220_v29 }
 0x119   : > { %v238_v32 = vmul.f32 %v381_v22, %v236_v31 }
 0x11a   : > { %v440_v33 = vpop.eup %439 }
 0x11b   : > { %v219_v34 = vmul.f32 0.6931472, %v440_v33  ;;  %v240_v35 = vsel %vm197_vm0, %v238_v32, 0.0 }
 0x11c   : > { %241 = vadd.xlane.f32.xlu0 %v240_v35 }
 0x11d   : > { %v221_v37 = vadd.f32 %v219_v34, %v203_v10 }
 0x11f   : > { %v237_v39 = vsub.f32 %v193_v2, %v221_v37 }
 0x121   : > { %v239_v40 = vmul.f32 %v382_v36, %v237_v39 }
 0x123   : > { %v243_v42 = vsel %vm197_vm0, %v239_v40, 0.0 }
 0x124   : > { %255 = vadd.xlane.f32.xlu0 %v254_v41  ;;  %244 = vadd.xlane.f32.xlu1 %v243_v42 }
 0x18f   : > { %v242_v43 = vpop.xlane.xlu0 %241 }
 0x190   : > { %v257_v45 = vmul.f32 %v253_v44, %v242_v43 }
 0x192   : > { %v259_v49 = vsub.f32 0.0, %v257_v45 }
 0x194   : > { %v262_v54 = vsel %vm261_vm3, %v259_v49, 0.0 }
 0x197   : > { %v245_v46 = vpop.xlane.xlu1 %244  ;;  %v256_v47 = vpop.xlane.xlu0 %255 }
 0x198   : > { %v258_v50 = vmul.f32 %v256_v47, %v245_v46  ;;  %v275_v51 = vsel %vm261_vm3, %v256_v47, 0.0 }
 0x199   : > { %v276_v52 = vadd.f32 %v275_v51, %v274_v48 }
 0x19a   : > { %v260_v53 = vsub.f32 0.0, %v258_v50 }
 0x19b   : > { %277 = vadd.xlane.f32.xlu0 %v276_v52 }
 0x19c   : > { %v263_v55 = vsel %vm261_vm3, %v260_v53, 0.0 }
 0x19d   : > { %v264_v56 = vadd.f32 %v263_v55, %v262_v54 }
 0x19f   : > { %265 = vadd.xlane.f32.xlu1 %v264_v56 }
 0x20e   : > { %v278_v57 = vpop.xlane.xlu0 %277 }
 0x20f   : > { %v279_v58 = vrot.slane %v278_v57, 4 }
 0x211   : > { %v280_v59 = vadd.f32 %v279_v58, %v278_v57 }
 0x212   : > { %v266_v60 = vpop.xlane.xlu1 %265 }
 0x213   : > { %v281_v61 = vrot.slane %v280_v59, 2  ;;  %v267_v62 = vrot.slane %v266_v60, 4 }
 0x215   : > { %v268_v63 = vadd.f32 %v267_v62, %v266_v60  ;;  %v282_v0 = vadd.f32 %v281_v61, %v280_v59 }
 0x217   : > { %v269_v1 = vrot.slane %v268_v63, 2  ;;  %v283_v3 = vrot.slane %v282_v0, 1 }
 0x219   : > { %v270_v2 = vadd.f32 %v269_v1, %v268_v63  ;;  %v284_v6 = vadd.f32 %v283_v3, %v282_v0 }
 0x21b   : > { %v271_v4 = vrot.slane %v270_v2, 1 }
 0x21d   : > { %v272_v5 = vadd.f32 %v271_v4, %v270_v2 }
 0x21f   : > { %385 = vpush %v272_v5 }
 0x220   : > { %387 = vpush %v284_v6 }
 0x250   : > { %s386_s19 = spop %385 }
 0x251   : > { %v290_v7 = vstv %s386_s19  ;;  %s388_s24 = spop %387 }
 0x252   : > { %v288_v8 = vstv %s388_s24 }
 0x253   : > { %v289_v9 = vsel %vm287_vm4, %v288_v8, 0.0 }
 0x254   : > { %v291_v10 = vsel %vm286_vm5, %v290_v7, %v289_v9 }
 0x255   : > { %292 = vst [vmem:[%s179_s11] sm:$0x1] %v291_v10 }
 0x256   : > { %468 = shalt.err (!%p465_p3)
}
 0x257   : > { %389 = dma.vmem_to_hbm [thread:$0]  (%p565_p5), %s305_s17, 16, %s307_s20, %s294_s25  }
 0x258 PF: > { %p395_p4 = scmp.ge.s32.totalorder %s503_s15, 2  ;;  %s318_s5 = sand.u32 1, %s491_s12  }
 0x259   : > { %s319_s6 = scalar_lea.sflag [#allocation3], %s318_s5 }
 0x25a   : > { %p392_p7 = pnand %p395_p4, %p569_p6 }
 0x25c   : > { %p393_p8 = pneg %p392_p7 }
 0x25e   : > { %486 = dma.done.wait (%p393_p8), %s319_s6, 16  }
 0x25f   : > { %488 = vsyncadd (%p393_p8), %s319_s6, 4294967280  ;;  %p13_p9 = scmp.ge.s32.totalorder %s552_s18, 5   ;;  %s637_s12 = smov %s495_s13 }
 0x260   : > { %s638_s13 = smov %s499_s14  ;;  %s639_s14 = smov %s563_s21 }
 0x261   : > { %s640_s15 = smov %s552_s18  ;;  %15 = sbr.rel (!%p13_p9) target bundleno = 3 (0x3), region = 70 }
 0x266   :  { %324 = vsyncpa [#allocation3], 1 }
 0x267   :  { %326 = vsyncpa [#allocation3 + $0x1], 1 }

</bundles_post_ra>
